<compile_context>
chip_gen: v7x
topology: tpu7x:2x2x1
jax: 0.10.0
libtpu: 0.0.40
codegen_flags: <defaults>
</compile_context>

<pallas_src>
import numpy as np
import jax
import jax.numpy as jnp
from jax import lax
from jax.experimental import pallas as pl
from jax.experimental.pallas import tpu as pltpu


def _round_up(n, m):
    return (n + m - 1) // m * m


def _embedding_kernel(idx_ref, table_ref, out_ref, acc_ref):
    # idx_ref:   (R, 1)   int32   VMEM  (adjusted flat indices for this row block)
    # table_ref: (Vb, D)  f32     VMEM  (one vocab block of the embedding table)
    # out_ref:   (R, D)   f32     VMEM
    # acc_ref:   (R, D)   f32     VMEM scratch (reduction over vocab blocks)
    v = pl.program_id(1)

    @pl.when(v == 0)
    def _():
        acc_ref[...] = jnp.zeros_like(acc_ref)

    r_blk = idx_ref.shape[0]
    v_blk = table_ref.shape[0]
    v_base = v * v_blk

    idx = idx_ref[...]                                              # (R, 1) int32
    col = lax.broadcasted_iota(jnp.int32, (r_blk, v_blk), 1) + v_base
    one_hot = (col == idx).astype(jnp.float32)                      # (R, Vb)

    acc_ref[...] += jnp.dot(
        one_hot,
        table_ref[...].astype(jnp.float32),
        preferred_element_type=jnp.float32,
    )

    @pl.when(v == pl.num_programs(1) - 1)
    def _():
        out_ref[...] = acc_ref[...].astype(out_ref.dtype)


def embedding_forward(x, offsets, table, *, block_rows=256, block_vocab=512):
    """x: (B, F) int32, offsets: (F,) int32, table: (V, D) f32 -> (B, F, D) f32."""
    B, F = x.shape
    V, D = table.shape
    N = B * F

    # Adjusted flat indices (vectorized once; replaces per-row scalar div/mod+add).
    idx = (x.astype(jnp.int32) + offsets.astype(jnp.int32)[None, :]).reshape(N, 1)

    # Block sizes: sublane-full rows, lane-aligned vocab blocks.
    R = min(block_rows, _round_up(N, 8))
    Vb = min(block_vocab, _round_up(V, 128))
    N_pad = _round_up(N, R)
    V_pad = _round_up(V, Vb)

    # Pad rows with -1 (matches no vocab column -> zero row, discarded below).
    idx_p = jnp.pad(idx, ((0, N_pad - N), (0, 0)), constant_values=-1)
    table_p = jnp.pad(table, ((0, V_pad - V), (0, 0)))

    grid = (N_pad // R, V_pad // Vb)   # (parallel row blocks, vocab reduction)

    out_flat = pl.pallas_call(
        _embedding_kernel,
        out_shape=jax.ShapeDtypeStruct((N_pad, D), table.dtype),
        grid=grid,
        in_specs=[
            pl.BlockSpec((R, 1), lambda i, v: (i, 0)),    # index block
            pl.BlockSpec((Vb, D), lambda i, v: (v, 0)),   # streamed table block
        ],
        out_specs=pl.BlockSpec((R, D), lambda i, v: (i, 0)),
        scratch_shapes=[pltpu.VMEM((R, D), jnp.float32)],
        compiler_params=pltpu.CompilerParams(
            dimension_semantics=("parallel", "arbitrary"),
        ),
    )(idx_p, table_p)

    return out_flat[:N].reshape(B, F, D)


if __name__ == "__main__":
    # Module config (synthetic, deterministic)
    num_features = (10, 20, 30)        # vocab sizes per categorical field
    embed_dim = 32
    B = 4
    F = len(num_features)
    vocab = sum(num_features) + 1      # matches torch.nn.Embedding(sum(...)+1, D)

    key = jax.random.PRNGKey(0)
    k_w, k_x = jax.random.split(key)

    # Xavier-uniform init of the embedding table (deterministic, no checkpoint).
    bound = float(np.sqrt(6.0 / (vocab + embed_dim)))
    table = jax.random.uniform(
        k_w, (vocab, embed_dim), dtype=jnp.float32, minval=-bound, maxval=bound
    )

    # feature_loc_offsets = (0, cumsum(num_features)[:-1])
    offsets = jnp.asarray(
        np.array((0, *np.cumsum(num_features)[:-1])), dtype=jnp.int32
    )

    # Per-field indices in [0, num_features[f])
    x_cols = []
    for k, nf in zip(jax.random.split(k_x, F), num_features):
        x_cols.append(jax.random.randint(k, (B,), 0, nf, dtype=jnp.int32))
    x = jnp.stack(x_cols, axis=1)      # (B, F) int32

    out = embedding_forward(x, offsets, table)
    out = jax.block_until_ready(out)

    # Pure-JAX reference (same semantics as the PyTorch module)
    ref = table[x + offsets[None, :]]
    assert out.shape == (B, F, embed_dim)
    assert jnp.allclose(out, ref), "Pallas embedding gather mismatch"

    print("KERNEL_OK")
</pallas_src>

<mosaic_0001>
module attributes {stable_mosaic.version = 11 : i64} {
  func.func @_embedding_kernel(%arg0: i32, %arg1: i32, %arg2: memref<16x1xi32, #tpu.memory_space<vmem>>, %arg3: memref<128x32xf32, #tpu.memory_space<vmem>>, %arg4: memref<16x32xf32, #tpu.memory_space<vmem>>, %arg5: memref<16x32xf32, #tpu.memory_space<vmem>>) attributes {dimension_semantics = [#tpu.dimension_semantics<parallel>, #tpu.dimension_semantics<arbitrary>], iteration_bounds = array<i64: 1, 1>, scalar_prefetch = 0 : i64, scratch_operands = 1 : i64, tpu.core_type = #tpu.core_type<tc>, window_params = [{transform_indices = @transform_0, window_bounds = array<i64: 16, 1>}, {transform_indices = @transform_1, window_bounds = array<i64: 128, 32>}, {transform_indices = @transform_2, window_bounds = array<i64: 16, 32>}]} {
    %c0_i32 = arith.constant 0 : i32
    %0 = arith.cmpi eq, %arg1, %c0_i32 : i32
    %1 = arith.extui %0 : i1 to i32
    %c0_i32_0 = arith.constant 0 : i32
    %2 = arith.cmpi ne, %1, %c0_i32_0 : i32
    scf.if %2 {
      %cst_10 = arith.constant 0.000000e+00 : f32
      %20 = vector.broadcast %cst_10 : f32 to vector<16x32xf32>
      %c0_11 = arith.constant 0 : index
      %c0_12 = arith.constant 0 : index
      %21 = vector.load %arg5[%c0_11, %c0_12] : memref<16x32xf32, #tpu.memory_space<vmem>>, vector<16x32xf32>
      tpu.vector_store %arg5[%c0_11, %c0_12], %20 {strides = array<i32>} : memref<16x32xf32, #tpu.memory_space<vmem>>, vector<16x32xf32>,
    } else {
    }
    %c128_i32 = arith.constant 128 : i32
    %3 = arith.muli %arg1, %c128_i32 : i32
    %c0 = arith.constant 0 : index
    %c0_1 = arith.constant 0 : index
    %4 = vector.load %arg2[%c0, %c0_1] : memref<16x1xi32, #tpu.memory_space<vmem>>, vector<16x1xi32>
    %5 = tpu.iota {dimensions = array<i32: 1>} : vector<16x128xi32>
    %6 = vector.broadcast %3 : i32 to vector<16x128xi32>
    %7 = arith.addi %5, %6 : vector<16x128xi32>
    %8 = vector.broadcast %4 : vector<16x1xi32> to vector<16x128xi32>
    %9 = arith.cmpi eq, %7, %8 : vector<16x128xi32>
    %10 = arith.extui %9 : vector<16x128xi1> to vector<16x128xi32>
    %11 = arith.sitofp %10 : vector<16x128xi32> to vector<16x128xf32>
    %c0_2 = arith.constant 0 : index
    %c0_3 = arith.constant 0 : index
    %12 = vector.load %arg5[%c0_2, %c0_3] : memref<16x32xf32, #tpu.memory_space<vmem>>, vector<16x32xf32>
    %c0_4 = arith.constant 0 : index
    %c0_5 = arith.constant 0 : index
    %13 = vector.load %arg3[%c0_4, %c0_5] : memref<128x32xf32, #tpu.memory_space<vmem>>, vector<128x32xf32>
    %cst = arith.constant dense<0.000000e+00> : vector<16x32xf32>
    %14 = tpu.matmul %11, %13, %cst {dimension_numbers = #tpu.dot_dimension_numbers<[1], [0], [0], [1], [0, 0, 1, 1], [], []>} : vector<16x128xf32>, vector<128x32xf32>, vector<16x32xf32> -> vector<16x32xf32>
    %15 = arith.addf %12, %14 : vector<16x32xf32>
    %c0_6 = arith.constant 0 : index
    %c0_7 = arith.constant 0 : index
    %16 = vector.load %arg5[%c0_6, %c0_7] : memref<16x32xf32, #tpu.memory_space<vmem>>, vector<16x32xf32>
    tpu.vector_store %arg5[%c0_6, %c0_7], %15 {strides = array<i32>} : memref<16x32xf32, #tpu.memory_space<vmem>>, vector<16x32xf32>,
    %c0_i32_8 = arith.constant 0 : i32
    %17 = arith.cmpi eq, %arg1, %c0_i32_8 : i32
    %18 = arith.extui %17 : i1 to i32
    %c0_i32_9 = arith.constant 0 : i32
    %19 = arith.cmpi ne, %18, %c0_i32_9 : i32
    scf.if %19 {
      %c0_10 = arith.constant 0 : index
      %c0_11 = arith.constant 0 : index
      %20 = vector.load %arg5[%c0_10, %c0_11] : memref<16x32xf32, #tpu.memory_space<vmem>>, vector<16x32xf32>
      %c0_12 = arith.constant 0 : index
      %c0_13 = arith.constant 0 : index
      %21 = vector.load %arg4[%c0_12, %c0_13] : memref<16x32xf32, #tpu.memory_space<vmem>>, vector<16x32xf32>
      tpu.vector_store %arg4[%c0_12, %c0_13], %20 {strides = array<i32>} : memref<16x32xf32, #tpu.memory_space<vmem>>, vector<16x32xf32>,
    } else {
    }
    return
  }
  func.func @transform_0(%arg0: i32, %arg1: i32) -> (i32, i32) {
    %c0_i32 = arith.constant 0 : i32
    %c0_i32_0 = arith.constant 0 : i32
    return %arg0, %c0_i32 : i32, i32
  }
  func.func @transform_1(%arg0: i32, %arg1: i32) -> (i32, i32) {
    %c0_i32 = arith.constant 0 : i32
    %c0_i32_0 = arith.constant 0 : i32
    return %arg1, %c0_i32 : i32, i32
  }
  func.func @transform_2(%arg0: i32, %arg1: i32) -> (i32, i32) {
    %c0_i32 = arith.constant 0 : i32
    %c0_i32_0 = arith.constant 0 : i32
    return %arg0, %c0_i32 : i32, i32
  }
}

</mosaic_0001>

<bundles_post_ra>
// kernel: tpu_custom_call.1
= control target key start
LH: loop header
LB: loop body
LE: loop exit
PB: predicated region body
PF: predicated region fallthrough
CT: control target
= control target key end

     0   :  { %v279_v2 = vmov 0   ;;  %s372_s0 = inlined_call_operand.vmem [shape: s32[16,1], index: 0, kind: input, shape index: {}]   ;;  %s373_s1 = inlined_call_operand.vmem [shape: f32[128,32], index: 1, kind: input, shape index: {}]   ;;  %s374_s2 = inlined_call_operand.hbm [shape: f32[16,32], index: 2, kind: output, shape index: {}]  }
   0x1   :  { %v20_v0 = vld [vmem:[%s372_s0] sm:$0xff]  ;;  %254 = vset.pattern.permute.xlu0 %v279_v2  ;;  %v41_v3 = vld [vmem:[%s373_s1 + $0x8] sm:$0xff]  ;;  %v42_v4 = vld [vmem:[%s373_s1 + $0x10] sm:$0xff] }
   0x2   :  { %v40_v1 = vld [vmem:[%s373_s1] sm:$0xff]  ;;  %v43_v5 = vld [vmem:[%s373_s1 + $0x18] sm:$0xff]  ;;  %27 = vperm.xlu0 %254, %v20_v0   ;;  %v21_v8 = vld [vmem:[%s372_s0 + $0x8] sm:$0xff] }
   0x3   :  { %v216_v6 = vpack.c.bf16 %v41_v3, %v40_v1  ;;  %v220_v7 = vpack.c.bf16 %v43_v5, %v42_v4  ;;  %v44_v9 = vld [vmem:[%s373_s1 + $0x20] sm:$0xff]  ;;  %v45_v10 = vld [vmem:[%s373_s1 + $0x28] sm:$0xff] }
   0x4   :  { %v224_v11 = vpack.c.bf16 %v45_v10, %v44_v9 }
   0x5   :  { %217 = vmatprep.subr.bf16.mxu0 %v216_v6 }
   0x6   :  { %219 = vmatpush3.bf16.msra.mxu0 %v216_v6  ;;  %30 = vperm.xlu0 %254, %v21_v8  }
   0x7   :  { %221 = vmatprep.subr.bf16.mxu0 %v220_v7 }
   0x8   :  { %7 = vsyncpa [#allocation4], 0  ;;  %v46_v12 = vld [vmem:[%s373_s1 + $0x30] sm:$0xff]  ;;  %v47_v13 = vld [vmem:[%s373_s1 + $0x38] sm:$0xff]  ;;  %vm16_vm0 = vcmask 261120   ;;  %v280_v14 = vmov 0.0   ;;  %v22_v28 = vlaneseq }
   0x9   :  { %18 = vst.msk [vmem:[#allocation2 + $0x8] sm:$0xff] %vm16_vm0, %v280_v14  ;;  %17 = vst.msk [vmem:[#allocation2] sm:$0xff] %vm16_vm0, %v280_v14  ;;  %v228_v15 = vpack.c.bf16 %v47_v13, %v46_v12  ;;  %v48_v16 = vld [vmem:[%s373_s1 + $0x40] sm:$0xff]  ;;  %v49_v17 = vld [vmem:[%s373_s1 + $0x48] sm:$0xff]  ;;  %v281_v31 = vmov 1.0  }
   0xa   :  { %223 = vmatpush3.bf16.msra.mxu0 %v220_v7  ;;  %v232_v18 = vpack.c.bf16 %v49_v17, %v48_v16  ;;  %v50_v19 = vld [vmem:[%s373_s1 + $0x50] sm:$0xff]  ;;  %v51_v20 = vld [vmem:[%s373_s1 + $0x58] sm:$0xff]  ;;  %v52_v22 = vld [vmem:[%s373_s1 + $0x60] sm:$0xff]  ;;  %v23_v29 = vand.u32 127, %v22_v28 }
   0xb   :  { %225 = vmatprep.subr.bf16.mxu0 %v224_v11  ;;  %v236_v21 = vpack.c.bf16 %v51_v20, %v50_v19  ;;  %v53_v23 = vld [vmem:[%s373_s1 + $0x68] sm:$0xff]  ;;  %v54_v25 = vld [vmem:[%s373_s1 + $0x70] sm:$0xff]  ;;  %v55_v26 = vld [vmem:[%s373_s1 + $0x78] sm:$0xff]  ;;  %s282_s1 = smov [#allocation3]  }
   0xc   :  { %v240_v24 = vpack.c.bf16 %v53_v23, %v52_v22  ;;  %v244_v27 = vpack.c.bf16 %v55_v26, %v54_v25  ;;  %s148_s16 = sshll.u32 %s282_s1, 4  ;;  %s149_s16 = int_to_ptr.vmem [resolvable:$true] %s148_s16 }
   0xd   :  { %s255_s17 = scalar_lea.vmem %s149_s16, 256  ;;  %p260_p1 = scmp.lt.s32.totalorder %s149_s16, %s149_s16 }
   0xe   :  { %227 = vmatpush3.bf16.msra.mxu0 %v224_v11  ;;  %p256_p0 = scmp.ne.s32.totalorder %s149_s16, %s255_s17  ;;  %p261_p2 = scmp.lt.s32.totalorder %s255_s17, %s255_s17 }
   0xf   :  { %229 = vmatprep.subr.bf16.mxu0 %v228_v15 }
  0x10   :  { %v39_v33 = vld [vmem:[#allocation2 + $0x8] sm:$0xff]  ;;  %v38_v34 = vld [vmem:[#allocation2] sm:$0xff]  ;;  %p262_p3 = por %p261_p2, %p260_p1 }
  0x12   :  { %231 = vmatpush3.bf16.msra.mxu0 %v228_v15  ;;  %p263_p4 = pnand %p262_p3, %p256_p0 }
  0x13   :  { %233 = vmatprep.subr.bf16.mxu0 %v232_v18 }
  0x16   :  { %235 = vmatpush3.bf16.msra.mxu0 %v232_v18 }
  0x17   :  { %237 = vmatprep.subr.bf16.mxu0 %v236_v21 }
  0x1a   :  { %239 = vmatpush3.bf16.msra.mxu0 %v236_v21 }
  0x1b   :  { %241 = vmatprep.subr.bf16.mxu0 %v240_v24 }
  0x1e   :  { %243 = vmatpush3.bf16.msra.mxu0 %v240_v24 }
  0x1f   :  { %245 = vmatprep.subr.bf16.mxu0 %v244_v27 }
  0x22   :  { %247 = vmatpush3.bf16.msra.mxu0 %v244_v27 }
  0x81   :  { %v28_v30 = vpop.permute.xlu0 %27 }
  0x82   :  { %vm32_vm1 = vcmp.eq.s32.totalorder %v23_v29, %v28_v30 }
  0x83   :  { %213 = vmatprep.mubr.msk.f32.mxu0 %vm32_vm1, %v281_v31 }
  0x85   :  { %v31_v32 = vpop.permute.xlu0 %30 }
  0x86   :  { %vm33_vm2 = vcmp.eq.s32.totalorder %v23_v29, %v31_v32 }
  0x87   :  { %214 = vmatmul.mubr.msk.f32.vlgmr.msra.gmra.mrb[0].mxu0 %vm33_vm2, %v281_v31 }
 0x15a   :  { %v215_v35 = vpop.f32.mrb[0].mxu0 }
 0x15b   :  { %v132_v36 = vadd.f32 %v215_v35, %v39_v33  ;;  %v122_v37 = vpop.f32.mrb[1].mxu0 }
 0x15c   :  { %v131_v38 = vadd.f32 %v122_v37, %v38_v34 }
 0x15d   :  { %135 = vst.msk [vmem:[#allocation2 + $0x8] sm:$0xff] %vm16_vm0, %v132_v36 }
 0x15e   :  { %134 = vst.msk [vmem:[#allocation2] sm:$0xff] %vm16_vm0, %v131_v38 }
 0x164   :  { %v140_v39 = vld [vmem:[#allocation2 + $0x8] sm:$0xff] }
 0x165   :  { %v139_v40 = vld [vmem:[#allocation2] sm:$0xff]  ;;  %142 = vst.msk [vmem:[#allocation3 + $0x8] sm:$0xff] %vm16_vm0, %v140_v39 }
 0x166   :  { %141 = vst.msk [vmem:[#allocation3] sm:$0xff] %vm16_vm0, %v139_v40 }
 0x167   :  { %266 = shalt.err (!%p263_p4)
}
 0x168   :  { %s267_s20 = scalar_lea.hbm %s374_s2, 256 }
 0x169   :  { %p268_p5 = scmp.ne.s32.totalorder %s374_s2, %s267_s20  ;;  %p271_p6 = scmp.lt.u32.totalorder %s267_s20, %s374_s2 }
 0x16b   :  { %p273_p7 = pnand %p271_p6, %p268_p5 }
 0x16d   :  { %276 = shalt.err (!%p273_p7)
}
 0x16e   :  { %s283_s25 = smov 128   ;;  %s284_s26 = smov 8  }
 0x16f   :  { %154 = dma.vmem_to_hbm [thread:$0]  %s149_s16, 256, %s374_s2, [#allocation4], %s283_s25, %s283_s25, %s284_s26  }
 0x170   :  { %277 = dma.done.wait [#allocation4], 256  }
 0x171   :  { %278 = vsyncadd [#allocation4], 4294967040 }
 0x172   :  { %158 = vsyncpa [#allocation4], 1 }

</bundles_post_ra>
